<compile_context>
chip_gen: v5e
topology: v5e:2x2
jax: 0.10.0
libtpu: 0.0.40
codegen_flags: <defaults>
</compile_context>

<pallas_src>
import functools

import jax
import jax.numpy as jnp
from jax.experimental import pallas as pl
from jax.experimental.pallas import tpu as pltpu

EPS = 1e-5


def _conv_block_kernel(p_ref, w_ref, o_ref, *, hw):
    # p_ref: (1, K, HW)   im2col patches for one batch element (K = 9*Cin, HW on lanes)
    # w_ref: (Cout, K)    fused 3x3 conv weights
    # o_ref: (1, Cout, HW)
    patches = p_ref[0]                                              # (K, HW)
    w = w_ref[...]                                                  # (Cout, K)

    # One MXU matmul replaces the 9 per-tap matmuls; output is lane-dense (HW on lanes).
    # (Conv bias intentionally omitted: cancelled exactly by InstanceNorm mean subtraction.)
    acc = jnp.dot(w, patches, preferred_element_type=jnp.float32)   # (Cout, HW) f32

    # Single-pass InstanceNorm2d: per-channel stats over the spatial (lane) axis.
    inv_hw = jnp.float32(1.0 / hw)
    s1 = jnp.sum(acc, axis=-1, keepdims=True)                       # (Cout, 1)
    s2 = jnp.sum(acc * acc, axis=-1, keepdims=True)                 # (Cout, 1)
    mean = s1 * inv_hw
    var = s2 * inv_hw - mean * mean                                 # biased variance
    normed = (acc - mean) * jax.lax.rsqrt(var + EPS)

    # ReLU (Dropout2d == identity in eval mode); unmasked lane-dense store.
    o_ref[0] = jnp.maximum(normed, 0.0).astype(o_ref.dtype)


def conv_block_forward(x_nchw, w_oihw, bias=None, drop_prob=0.0):
    """PyTorch-equivalent ConvBlock.forward (eval mode).  x_nchw: (N, Cin, H, W) float32.

    `bias` is accepted for API parity with nn.Conv2d but is mathematically a no-op
    under InstanceNorm2d(affine=False), so it is never sent to the kernel.
    """
    del bias, drop_prob  # bias cancels under InstanceNorm; dropout is identity in eval.
    N, Cin, H, W = x_nchw.shape
    Cout = w_oihw.shape[0]
    HW = H * W
    K = 9 * Cin

    # ---- layout plumbing in plain JAX (outside the kernel) ----
    # Spatial zero-pad, then im2col with the contraction dim (tap-major, channel-minor)
    # on sublanes and the flattened spatial dim on lanes.
    x_pad = jnp.pad(x_nchw, ((0, 0), (0, 0), (1, 1), (1, 1)))        # (N, Cin, H+2, W+2)
    taps = [x_pad[:, :, kh:kh + H, kw:kw + W]                        # each (N, Cin, H, W)
            for kh in range(3) for kw in range(3)]
    patches = jnp.stack(taps, axis=1).reshape(N, K, HW)              # (N, 9*Cin, H*W)

    # (Cout, Cin, 3, 3) -> (Cout, 3, 3, Cin) -> (Cout, 9*Cin): matches patch ordering.
    w_mat = jnp.transpose(w_oihw, (0, 2, 3, 1)).reshape(Cout, K)

    kernel = functools.partial(_conv_block_kernel, hw=HW)

    out = pl.pallas_call(
        kernel,
        out_shape=jax.ShapeDtypeStruct((N, Cout, HW), jnp.float32),
        grid_spec=pltpu.PrefetchScalarGridSpec(
            num_scalar_prefetch=0,
            grid=(N,),
            in_specs=[
                pl.BlockSpec((1, K, HW), lambda n: (n, 0, 0)),       # per-batch patches
                pl.BlockSpec((Cout, K), lambda n: (0, 0)),           # shared weights
            ],
            out_specs=pl.BlockSpec((1, Cout, HW), lambda n: (n, 0, 0)),
        ),
        compiler_params=pltpu.CompilerParams(
            # Batch axis is embarrassingly parallel (uses both TensorCores on v7x).
            dimension_semantics=("parallel",),
            # Explicit, modest VMEM budget: safe on v7x's 64 MiB as well as v5e/v6e.
            vmem_limit_bytes=32 * 1024 * 1024,
        ),
    )(patches, w_mat)

    # Output is already channel-major; just un-flatten the spatial axis -> NCHW.
    return out.reshape(N, Cout, H, W)


def _reference(x_nchw, w_oihw, bias):
    """Pure-JAX reference (conv + bias + instance norm + relu) for validation."""
    x_nhwc = jnp.transpose(x_nchw, (0, 2, 3, 1))
    w_hwio = jnp.transpose(w_oihw, (2, 3, 1, 0))
    y = jax.lax.conv_general_dilated(
        x_nhwc, w_hwio, window_strides=(1, 1), padding='SAME',
        dimension_numbers=('NHWC', 'HWIO', 'NHWC')) + bias
    mean = jnp.mean(y, axis=(1, 2), keepdims=True)
    var = jnp.var(y, axis=(1, 2), keepdims=True)
    y = jnp.maximum((y - mean) * jax.lax.rsqrt(var + EPS), 0.0)
    return jnp.transpose(y, (0, 3, 1, 2))


if __name__ == "__main__":
    # Small shapes consistent with ConvBlock(in_chans=4, out_chans=8, drop_prob=0.0).
    N, Cin, Cout, H, W = 2, 4, 8, 16, 16

    key = jax.random.PRNGKey(0)
    kx, kw, kb = jax.random.split(key, 3)
    x = jax.random.normal(kx, (N, Cin, H, W), dtype=jnp.float32)
    # Conv2d weight shape: (out, in, 3, 3), bias: (out,).
    weight = jax.random.normal(kw, (Cout, Cin, 3, 3), dtype=jnp.float32) * 0.1
    bias = jax.random.normal(kb, (Cout,), dtype=jnp.float32) * 0.1

    out = jax.block_until_ready(conv_block_forward(x, weight, bias))
    ref = jax.block_until_ready(_reference(x, weight, bias))

    assert out.shape == (N, Cout, H, W), out.shape
    assert jnp.allclose(out, ref, atol=1e-4, rtol=1e-4), \
        f"max abs err {jnp.max(jnp.abs(out - ref))}"

    print("KERNEL_OK")
</pallas_src>

<mosaic_0001>
module attributes {stable_mosaic.version = 11 : i64} {
  func.func @_conv_block_kernel(%arg0: i32, %arg1: memref<1x36x256xf32, #tpu.memory_space<vmem>>, %arg2: memref<8x36xf32, #tpu.memory_space<vmem>>, %arg3: memref<1x8x256xf32, #tpu.memory_space<vmem>>) attributes {dimension_semantics = [#tpu.dimension_semantics<parallel>], iteration_bounds = array<i64: 2>, scalar_prefetch = 0 : i64, scratch_operands = 0 : i64, tpu.core_type = #tpu.core_type<tc>, window_params = [{transform_indices = @transform_0, window_bounds = array<i64: 1, 36, 256>}, {pipeline_mode = #tpu.pipeline_mode<synchronous>, transform_indices = @transform_1, window_bounds = array<i64: 8, 36>}, {transform_indices = @transform_2, window_bounds = array<i64: 1, 8, 256>}]} {
    %c0 = arith.constant 0 : index
    %c0_0 = arith.constant 0 : index
    %c0_1 = arith.constant 0 : index
    %0 = vector.load %arg1[%c0, %c0_0, %c0_1] : memref<1x36x256xf32, #tpu.memory_space<vmem>>, vector<1x36x256xf32>
    %1 = vector.shape_cast %0 : vector<1x36x256xf32> to vector<36x256xf32>
    %c0_2 = arith.constant 0 : index
    %c0_3 = arith.constant 0 : index
    %2 = vector.load %arg2[%c0_2, %c0_3] : memref<8x36xf32, #tpu.memory_space<vmem>>, vector<8x36xf32>
    %cst = arith.constant dense<0.000000e+00> : vector<8x256xf32>
    %3 = tpu.matmul %2, %1, %cst {dimension_numbers = #tpu.dot_dimension_numbers<[1], [0], [0], [1], [0, 0, 1, 1], [], []>} : vector<8x36xf32>, vector<36x256xf32>, vector<8x256xf32> -> vector<8x256xf32>
    %cst_4 = arith.constant dense<0.000000e+00> : vector<8xf32>
    %4 = vector.multi_reduction <add>, %3, %cst_4 [1] : vector<8x256xf32> to vector<8xf32>
    %5 = vector.shape_cast %4 : vector<8xf32> to vector<8x1xf32>
    %6 = arith.mulf %3, %3 : vector<8x256xf32>
    %cst_5 = arith.constant dense<0.000000e+00> : vector<8xf32>
    %7 = vector.multi_reduction <add>, %6, %cst_5 [1] : vector<8x256xf32> to vector<8xf32>
    %8 = vector.shape_cast %7 : vector<8xf32> to vector<8x1xf32>
    %cst_6 = arith.constant 3.906250e-03 : f32
    %9 = vector.broadcast %cst_6 : f32 to vector<8x1xf32>
    %10 = arith.mulf %5, %9 : vector<8x1xf32>
    %cst_7 = arith.constant 3.906250e-03 : f32
    %11 = vector.broadcast %cst_7 : f32 to vector<8x1xf32>
    %12 = arith.mulf %8, %11 : vector<8x1xf32>
    %13 = arith.mulf %10, %10 : vector<8x1xf32>
    %14 = arith.subf %12, %13 : vector<8x1xf32>
    %15 = vector.broadcast %10 : vector<8x1xf32> to vector<8x256xf32>
    %16 = arith.subf %3, %15 : vector<8x256xf32>
    %cst_8 = arith.constant 9.99999974E-6 : f32
    %17 = vector.broadcast %cst_8 : f32 to vector<8x1xf32>
    %18 = arith.addf %14, %17 : vector<8x1xf32>
    %19 = math.rsqrt %18 : vector<8x1xf32>
    %20 = vector.broadcast %19 : vector<8x1xf32> to vector<8x256xf32>
    %21 = arith.mulf %16, %20 : vector<8x256xf32>
    %cst_9 = arith.constant 0.000000e+00 : f32
    %22 = vector.broadcast %cst_9 : f32 to vector<8x256xf32>
    %23 = arith.maximumf %21, %22 : vector<8x256xf32>
    %c0_10 = arith.constant 0 : index
    %c0_11 = arith.constant 0 : index
    %c0_12 = arith.constant 0 : index
    %24 = vector.load %arg3[%c0_10, %c0_11, %c0_12] : memref<1x8x256xf32, #tpu.memory_space<vmem>>, vector<1x8x256xf32>
    %25 = vector.shape_cast %24 : vector<1x8x256xf32> to vector<8x256xf32>
    %26 = vector.shape_cast %23 : vector<8x256xf32> to vector<1x8x256xf32>
    tpu.vector_store %arg3[%c0_10, %c0_11, %c0_12], %26 {strides = array<i32>} : memref<1x8x256xf32, #tpu.memory_space<vmem>>, vector<1x8x256xf32>,
    return
  }
  func.func @transform_0(%arg0: i32) -> (i32, i32, i32) {
    %c0_i32 = arith.constant 0 : i32
    %c0_i32_0 = arith.constant 0 : i32
    %c0_i32_1 = arith.constant 0 : i32
    return %arg0, %c0_i32, %c0_i32_0 : i32, i32, i32
  }
  func.func @transform_1(%arg0: i32) -> (i32, i32) {
    %c0_i32 = arith.constant 0 : i32
    %c0_i32_0 = arith.constant 0 : i32
    %c0_i32_1 = arith.constant 0 : i32
    return %c0_i32, %c0_i32_0 : i32, i32
  }
  func.func @transform_2(%arg0: i32) -> (i32, i32, i32) {
    %c0_i32 = arith.constant 0 : i32
    %c0_i32_0 = arith.constant 0 : i32
    %c0_i32_1 = arith.constant 0 : i32
    return %arg0, %c0_i32, %c0_i32_0 : i32, i32, i32
  }
}

</mosaic_0001>

<bundles_post_ra>
// kernel: tpu_custom_call.1
= control target key start
LH: loop header
LB: loop body
LE: loop exit
PB: predicated region body
PF: predicated region fallthrough
CT: control target
= control target key end

     0   :  { %7 = vsyncpa [#allocation3], 0  ;;  %s536_s0 = inlined_call_operand.vmem [shape: f32[2,36,256], index: 0, kind: input, shape index: {}]   ;;  %s537_s1 = inlined_call_operand.vmem [shape: f32[8,36], index: 1, kind: input, shape index: {}]   ;;  %s538_s2 = inlined_call_operand.hbm [shape: f32[2,8,256], index: 2, kind: output, shape index: {}]  }
   0x1   :  { %9 = vsyncpa [#allocation3 + $0x1], 0  ;;  %s448_s9 = smov 0   ;;  %s450_s10 = smov 0  }
   0x2   :  { %s452_s11 = smov 0   ;;  %s454_s12 = smov 0  }
   0x3 LB: > { %s469_s13 = sadd.s32 4294967295, %s431_s12   ;;  %s311_s14 = sadd.s32 4294967294, %s431_s12   ;;  %s431_s12 = sphi %s454_s12, %s544_s12   ;;  %s427_s11 = sphi %s452_s11, %s543_s11   ;;  %s423_s10 = sphi %s450_s10, %s542_s10   ;;  %s419_s9 = sphi %s448_s9, %s541_s9  }
   0x4   : > { %s473_s15 = sadd.s32 1, %s431_s12   ;;  %s69_s16 = sadd.s32 1, %s427_s11 }
   0x5   : > { %s66_s17 = ssub.s32 %s431_s12, %s473_s15  ;;  %p79_p0 = scmp.ne.s32.totalorder %s427_s11, %s423_s10 }
   0x6   : > { %p67_p1 = scmp.eq.s32.totalorder %s66_s17, 0  ;;  %p80_p2 = scmp.eq.s32.totalorder %s469_s13, 1 }
   0x7   : > { %p85_p3 = scmp.ne.s32.totalorder %s423_s10, %s419_s9  ;;  %p86_p4 = scmp.eq.s32.totalorder %s311_s14, 1 }
   0x8   : > { %s484_s18 = scalar_select %p67_p1, %s427_s11, %s69_s16  }
   0x9   : > { %p486_p5 = por %p80_p2, %p79_p0  ;;  %p490_p6 = por %p86_p4, %p85_p3 }
   0xa   : > { %p314_p7 = scmp.ge.s32.totalorder %s431_s12, 1  ;;  %p115_p8 = scmp.lt.s32.totalorder %s431_s12, 3 }
   0xc   : > { %p116_p9 = pnand %p314_p7, %p115_p8 }
   0xd   : > { %p137_p10 = scmp.lt.s32.totalorder (!%p116_p9), %s469_s13, 1  ;;  %s134_s28 = sand.u32 (!%p116_p9), 1, %s423_s10  }
   0xe   : > { %119 = sbr.rel (%p116_p9) target bundleno = 318 (0x13e), region = 28  ;;  %s315_s29 = sshll.u32 (!%p116_p9), %s134_s28, 4 }
   0xf   : > { %s326_s30 = sshll.u32 (!%p116_p9), %s469_s13, 4  ;;  %s136_s6 = scalar_lea.vmem (!%p116_p9), [#allocation2], %s315_s29 }
  0x10   : > { %s247_s5 = scalar_lea.hbm (!%p116_p9), %s538_s2, %s326_s30  ;;  %s249_s7 = sshll.u32 (!%p116_p9), %s136_s6, 4  ;;  %s250_s7 = int_to_ptr.vmem [resolvable:$true] %s249_s7 }
  0x11   : > { %s251_s8 = sshll.u32 (!%p116_p9), %s247_s5, 4  ;;  %s252_s8 = int_to_ptr.hbm [resolvable:$true] %s251_s8 }
  0x12   : > { %s383_s14 = sshra.s32 (!%p116_p9), %s252_s8, 4  ;;  %s384_s14 = int_to_ptr.hbm [resolvable:$true] %s383_s14 }
  0x13   : > { %s138_s21 = scalar_select %p137_p10, %s469_s13, 1  ;;  %vm157_vm0 = vcmask 1043456   ;;  %v152_v10 = vld [vmem:[%s537_s1] sm:$0xff]  ;;  %vm153_vm1 = vcmask 293888  }
  0x14   : > { %s236_s13 = scalar_lea.sflag [#allocation3], %s134_s28  ;;  %s385_s16 = scalar_lea.hbm %s384_s14, 16 }
  0x15   : > { %s327_s22 = smul.u32 80, %s138_s21  ;;  %p386_p11 = scmp.ne.s32.totalorder %s384_s14, %s385_s16 }
  0x16   : > { %p390_p0 = scmp.lt.s32.totalorder %s384_s14, %s538_s2 }
  0x17   : > { %s141_s25 = scalar_lea.vmem %s536_s0, %s327_s22  ;;  %p387_p12 = pnand %p386_p11, %p486_p5 }
  0x18   : > { %v150_v0 = vld [vmem:[%s141_s25 + $0x40] sm:$0xf]  ;;  %v151_v1 = vld [vmem:[%s141_s25 + $0x48] sm:$0xf]  ;;  %v148_v2 = vld [vmem:[%s141_s25 + $0x30] sm:$0xff]  ;;  %s389_s22 = scalar_lea.hbm %s538_s2, 32 }
  0x19   : > { %317 = vmatpush.msk.msra.mxu0 %vm157_vm0, %v150_v0  ;;  %319 = vmatpush.msk.msra.mxu1 %vm157_vm0, %v151_v1  ;;  %v149_v3 = vld [vmem:[%s141_s25 + $0x38] sm:$0xff]  ;;  %v146_v4 = vld [vmem:[%s141_s25 + $0x20] sm:$0xff]  ;;  %v147_v5 = vld [vmem:[%s141_s25 + $0x28] sm:$0xff]  ;;  %p388_p13 = pneg %p387_p12  ;;  %p391_p1 = scmp.lt.s32.totalorder %s389_s22, %s385_s16 }
  0x1a   : > { %v144_v6 = vld [vmem:[%s141_s25 + $0x10] sm:$0xff]  ;;  %v145_v7 = vld [vmem:[%s141_s25 + $0x18] sm:$0xff]  ;;  %v142_v8 = vld [vmem:[%s141_s25] sm:$0xff] }
  0x1b   : > { %176 = vmatpush.msra.mxu0 %v148_v2  ;;  %196 = vmatpush.msra.mxu1 %v149_v3  ;;  %v143_v9 = vld [vmem:[%s141_s25 + $0x8] sm:$0xff]  ;;  %p392_p2 = por %p391_p1, %p390_p0 }
  0x1d   : > { %177 = vmatpush.msra.mxu0 %v146_v4  ;;  %197 = vmatpush.msra.mxu1 %v147_v5  ;;  %p393_p3 = pnand %p392_p2, %p388_p13 }
  0x1f   : > { %178 = vmatpush.msra.mxu0 %v144_v6  ;;  %198 = vmatpush.msra.mxu1 %v145_v7 }
  0x21   : > { %179 = vmatpush.msra.mxu0 %v142_v8  ;;  %199 = vmatpush.msra.mxu1 %v143_v9 }
  0x22   : > { %318 = vmatmul.msk.f32.vlgmr.msra.gmra.mxu0 %vm153_vm1, %v152_v10  ;;  %320 = vmatmul.msk.f32.vlgmr.msra.gmra.mxu1 %vm153_vm1, %v152_v10 }
  0x9f   : > { %v181_v11 = vpop.f32.mrf.mxu0  ;;  %v201_v12 = vpop.f32.mrf.mxu1 }
  0xa0   : > { %v204_v13 = vadd.f32 %v201_v12, %v181_v11  ;;  %v207_v14 = vmul.f32 %v181_v11, %v181_v11  ;;  %v208_v15 = vmul.f32 %v201_v12, %v201_v12 }
  0xa2   : > { %205 = vadd.xlane.f32.xlu0 %v204_v13  ;;  %v209_v16 = vadd.f32 %v208_v15, %v207_v14 }
  0xaa   : > { %210 = vadd.xlane.f32.xlu0 %v209_v16 }
 0x115   : > { %v206_v17 = vpop.xlane.xlu0 %205 }
 0x116   : > { %v212_v18 = vmul.f32 0.00390625, %v206_v17 }
 0x118   : > { %v214_v20 = vmul.f32 %v212_v18, %v212_v18  ;;  %v216_v30 = vsub.f32 %v181_v11, %v212_v18  ;;  %v217_v31 = vsub.f32 %v201_v12, %v212_v18 }
 0x11d   : > { %v211_v19 = vpop.xlane.xlu0 %210 }
 0x11e   : > { %v213_v21 = vmul.f32 0.00390625, %v211_v19 }
 0x120   : > { %v215_v22 = vsub.f32 %v213_v21, %v214_v20 }
 0x122   : > { %v218_v23 = vadd.f32 1e-05, %v215_v22 }
 0x124   : > { %367 = vrsqrt.f32 %v218_v23  ;;  %vm225_vm3 = vweird.f32 %v218_v23 }
 0x12a   : > { %v368_v24 = vpop.eup %367 }
 0x12b   : > { %v220_v25 = vmul.f32 %v368_v24, %v218_v23  ;;  %vm226_vm2 = vweird.f32 %v368_v24 }
 0x12c   : > { %vm227_vm4 = vmor %vm225_vm3, %vm226_vm2 }
 0x12d   : > { %v221_v26 = vmul.f32 %v368_v24, %v220_v25 }
 0x12f   : > { %v222_v27 = vmul.f32 0.5, %v221_v26 }
 0x131   : > { %v223_v28 = vsub.f32 1.5, %v222_v27 }
 0x133   : > { %v224_v29 = vmul.f32 %v368_v24, %v223_v28 }
 0x135   : > { %v228_v32 = vsel %vm227_vm4, %v368_v24, %v224_v29 }
 0x136   : > { %v229_v33 = vmul.f32 %v228_v32, %v216_v30  ;;  %v230_v34 = vmul.f32 %v228_v32, %v217_v31 }
 0x138   : > { %v231_v35 = vmax.f32 %v229_v33, 0.0  ;;  %v232_v36 = vmax.f32 %v230_v34, 0.0 }
 0x13a   : > { %233 = vst [vmem:[%s136_s6] sm:$0xff] %v231_v35 }
 0x13b   : > { %234 = vst [vmem:[%s136_s6 + $0x8] sm:$0xff] %v232_v36 }
 0x13c   : > { %396 = shalt.err (!%p393_p3)
}
 0x13d   : > { %328 = dma.vmem_to_hbm [thread:$0]  (%p486_p5), %s250_s7, 256, %s252_s8, %s236_s13  }
 0x13e PF: > { %p334_p4 = scmp.ge.s32.totalorder %s431_s12, 2  ;;  %s263_s25 = sand.u32 1, %s419_s9  }
 0x13f   : > { %s264_s26 = scalar_lea.sflag [#allocation3], %s263_s25 }
 0x140   : > { %p331_p7 = pnand %p334_p4, %p490_p6 }
 0x142   : > { %p332_p8 = pneg %p331_p7 }
 0x144   : > { %414 = dma.done.wait (%p332_p8), %s264_s26, 256  }
 0x145   : > { %416 = vsyncadd (%p332_p8), %s264_s26, 4294967040  ;;  %p12_p9 = scmp.ge.s32.totalorder %s473_s15, 4   ;;  %s541_s9 = smov %s423_s10 }
 0x146   : > { %s542_s10 = smov %s427_s11  ;;  %s543_s11 = smov %s484_s18 }
 0x147   : > { %s544_s12 = smov %s473_s15  ;;  %14 = sbr.rel (!%p12_p9) target bundleno = 3 (0x3), region = 63 }
 0x14c   :  { %270 = vsyncpa [#allocation3], 1 }
 0x14d   :  { %272 = vsyncpa [#allocation3 + $0x1], 1 }

</bundles_post_ra>
